<compile_context>
chip_gen: v6e
topology: v6e:2x2x1
jax: 0.10.0
libtpu: 0.0.40
codegen_flags: <defaults>
</compile_context>

<pallas_src>
import jax
import jax.numpy as jnp
from jax.experimental import pallas as pl
from jax.experimental.pallas import tpu as pltpu

_NEG_SLOPE = 0.01   # PyTorch LeakyReLU default
_LANE = 128


def _leaky_relu(x, negative_slope=_NEG_SLOPE):
    return jnp.where(x > 0, x, negative_slope * x)


def _round_up(x, m):
    return (x + m - 1) // m * m


def mlp_decoder1_kernel(
    x_ref,
    w1_ref, b1_ref,
    w2_ref, b2_ref,
    w3_ref, b3_ref,
    w4_ref, b4_ref,
    w5_ref, b5_ref,
    o_ref,
):
    # bf16 operands on the MXU, f32 accumulation + bias + LeakyReLU on the VPU.
    h = x_ref[...].astype(jnp.bfloat16)

    # Layer 1: Linear(dim_input -> dim_input*2) + LeakyReLU
    h = jnp.dot(h, w1_ref[...], preferred_element_type=jnp.float32) + b1_ref[...]
    h = _leaky_relu(h).astype(jnp.bfloat16)

    # Layer 2: Linear(dim_input*2 -> max) + LeakyReLU
    h = jnp.dot(h, w2_ref[...], preferred_element_type=jnp.float32) + b2_ref[...]
    h = _leaky_relu(h).astype(jnp.bfloat16)

    # Layer 3: Linear(max -> max) + LeakyReLU
    h = jnp.dot(h, w3_ref[...], preferred_element_type=jnp.float32) + b3_ref[...]
    h = _leaky_relu(h).astype(jnp.bfloat16)

    # Layer 4: Linear(max -> max//2) + LeakyReLU
    h = jnp.dot(h, w4_ref[...], preferred_element_type=jnp.float32) + b4_ref[...]
    h = _leaky_relu(h).astype(jnp.bfloat16)

    # Layer 5: Linear(max//2 -> dim_output_padded), no activation.
    # W5/b5 are zero-padded on the output axis to 128 lanes -> unmasked stores.
    y = jnp.dot(h, w5_ref[...], preferred_element_type=jnp.float32) + b5_ref[...]

    o_ref[...] = y.astype(o_ref.dtype)


def make_params(key, dim_input, dim_output,
                w_dtype=jnp.bfloat16, b_dtype=jnp.float32):
    """Deterministic synthetic parameters with the same shapes as the module.

    Weights are [in_features, out_features] (transposed vs. PyTorch); biases
    are [1, out_features] so they broadcast over the batch inside the kernel.
    Weights are stored in bf16 (f32 accumulation happens in the kernel).
    """
    dim_max = max(dim_input * 2, 256)
    layer_dims = [
        (dim_input, dim_input * 2),
        (dim_input * 2, dim_max),
        (dim_max, dim_max),
        (dim_max, dim_max // 2),
        (dim_max // 2, dim_output),
    ]
    params = []
    for fan_in, fan_out in layer_dims:
        key, wk, bk = jax.random.split(key, 3)
        bound = 1.0 / float(fan_in) ** 0.5
        w = jax.random.uniform(wk, (fan_in, fan_out), jnp.float32, -bound, bound)
        b = jax.random.uniform(bk, (1, fan_out), jnp.float32, -bound, bound)
        params.append((w.astype(w_dtype), b.astype(b_dtype)))
    return params


def mlp_decoder1(x, params, *, batch_tile=256):
    """Fused MLPDecoder1 forward.  x: [batch, dim_input] (f32)."""
    batch, dim_input = x.shape
    w5, b5 = params[-1]
    dim_output = w5.shape[1]

    # ---- lane-dense output: zero-pad the final layer's output dim to 128 ----
    dim_out_p = _round_up(dim_output, _LANE)
    if dim_out_p != dim_output:
        w5 = jnp.pad(w5, ((0, 0), (0, dim_out_p - dim_output)))
        b5 = jnp.pad(b5, ((0, 0), (0, dim_out_p - dim_output)))
    padded_params = list(params[:-1]) + [(w5, b5)]

    # ---- batch tiling: TB is a multiple of 8 sublanes (cap at batch_tile) ----
    # batch_tile=256 matches v6e/v7x MXU M-granularity; use 128 on v5e if desired.
    tb = min(batch_tile, _round_up(batch, 8))
    batch_p = _round_up(batch, tb)
    if batch_p != batch:
        x = jnp.pad(x, ((0, batch_p - batch), (0, 0)))
    grid = (batch_p // tb,)

    flat_params = []
    in_specs = [pl.BlockSpec((tb, dim_input), lambda i: (i, 0))]
    for (w, b) in padded_params:
        flat_params.extend([w, b])
        # Constant (0, 0) index maps: weights/biases stay resident in VMEM
        # across all batch tiles instead of being re-fetched per step.
        in_specs.append(pl.BlockSpec(w.shape, lambda i: (0, 0)))
        in_specs.append(pl.BlockSpec(b.shape, lambda i: (0, 0)))

    out_shape = jax.ShapeDtypeStruct((batch_p, dim_out_p), x.dtype)

    # Advisory cost so XLA does not over/under-schedule around this short call.
    flops = 2 * batch_p * sum(w.shape[0] * w.shape[1] for w, _ in padded_params)
    bytes_accessed = (
        x.size * x.dtype.itemsize
        + sum(w.size * w.dtype.itemsize + b.size * b.dtype.itemsize
              for w, b in padded_params)
        + batch_p * dim_out_p * x.dtype.itemsize
    )
    cost = pl.CostEstimate(flops=flops, transcendentals=0,
                           bytes_accessed=bytes_accessed)

    y = pl.pallas_call(
        mlp_decoder1_kernel,
        grid=grid,
        in_specs=in_specs,
        out_specs=pl.BlockSpec((tb, dim_out_p), lambda i: (i, 0)),
        out_shape=out_shape,
        compiler_params=pltpu.CompilerParams(
            dimension_semantics=("parallel",),   # shard batch tiles across v7x's 2 TCs
            vmem_limit_bytes=8 << 20,            # kernel needs well under 4 MiB
        ),
        cost_estimate=cost,
    )(x, *flat_params)

    return y[:batch, :dim_output]


def mlp_decoder1_ref(x, params):
    """Pure-JAX (f32) reference of the PyTorch forward with the same params."""
    h = x.astype(jnp.float32)
    for i, (w, b) in enumerate(params):
        h = h @ w.astype(jnp.float32) + b.astype(jnp.float32)
        if i < len(params) - 1:
            h = _leaky_relu(h)
    return h.astype(x.dtype)


if __name__ == "__main__":
    key = jax.random.PRNGKey(0)
    batch = 8
    dim_input = 32
    dim_output = 8

    key, xk, pk = jax.random.split(key, 3)
    x = jax.random.normal(xk, (batch, dim_input), jnp.float32)
    params = make_params(pk, dim_input, dim_output)

    out = mlp_decoder1(x, params)
    out = jax.block_until_ready(out)

    ref = mlp_decoder1_ref(x, params)
    assert out.shape == (batch, dim_output), out.shape
    # bf16 matmul operands with f32 accumulation: loosen tolerance vs f32 ref.
    assert jnp.allclose(out, ref, atol=2e-2, rtol=2e-2), "mismatch vs reference"

    print("KERNEL_OK")
</pallas_src>

<mosaic_0001>
module attributes {stable_mosaic.version = 11 : i64} {
  func.func @mlp_decoder1_kernel(%arg0: i32, %arg1: memref<8x32xf32, #tpu.memory_space<vmem>>, %arg2: memref<32x64xbf16, #tpu.memory_space<vmem>>, %arg3: memref<1x64xf32, #tpu.memory_space<vmem>>, %arg4: memref<64x256xbf16, #tpu.memory_space<vmem>>, %arg5: memref<1x256xf32, #tpu.memory_space<vmem>>, %arg6: memref<256x256xbf16, #tpu.memory_space<vmem>>, %arg7: memref<1x256xf32, #tpu.memory_space<vmem>>, %arg8: memref<256x128xbf16, #tpu.memory_space<vmem>>, %arg9: memref<1x128xf32, #tpu.memory_space<vmem>>, %arg10: memref<128x128xbf16, #tpu.memory_space<vmem>>, %arg11: memref<1x128xf32, #tpu.memory_space<vmem>>, %arg12: memref<8x128xf32, #tpu.memory_space<vmem>>) attributes {dimension_semantics = [#tpu.dimension_semantics<parallel>], iteration_bounds = array<i64: 1>, scalar_prefetch = 0 : i64, scratch_operands = 0 : i64, tpu.core_type = #tpu.core_type<tc>, window_params = [{transform_indices = @transform_0, window_bounds = array<i64: 8, 32>}, {pipeline_mode = #tpu.pipeline_mode<synchronous>, transform_indices = @transform_1, window_bounds = array<i64: 32, 64>}, {pipeline_mode = #tpu.pipeline_mode<synchronous>, transform_indices = @transform_2, window_bounds = array<i64: 1, 64>}, {pipeline_mode = #tpu.pipeline_mode<synchronous>, transform_indices = @transform_3, window_bounds = array<i64: 64, 256>}, {pipeline_mode = #tpu.pipeline_mode<synchronous>, transform_indices = @transform_4, window_bounds = array<i64: 1, 256>}, {pipeline_mode = #tpu.pipeline_mode<synchronous>, transform_indices = @transform_5, window_bounds = array<i64: 256, 256>}, {pipeline_mode = #tpu.pipeline_mode<synchronous>, transform_indices = @transform_6, window_bounds = array<i64: 1, 256>}, {pipeline_mode = #tpu.pipeline_mode<synchronous>, transform_indices = @transform_7, window_bounds = array<i64: 256, 128>}, {pipeline_mode = #tpu.pipeline_mode<synchronous>, transform_indices = @transform_8, window_bounds = array<i64: 1, 128>}, {pipeline_mode = #tpu.pipeline_mode<synchronous>, transform_indices = @transform_9, window_bounds = array<i64: 128, 128>}, {pipeline_mode = #tpu.pipeline_mode<synchronous>, transform_indices = @transform_10, window_bounds = array<i64: 1, 128>}, {transform_indices = @transform_11, window_bounds = array<i64: 8, 128>}]} {
    %c0 = arith.constant 0 : index
    %c0_0 = arith.constant 0 : index
    %0 = vector.load %arg1[%c0, %c0_0] : memref<8x32xf32, #tpu.memory_space<vmem>>, vector<8x32xf32>
    %1 = arith.truncf %0 : vector<8x32xf32> to vector<8x32xbf16>
    %c0_1 = arith.constant 0 : index
    %c0_2 = arith.constant 0 : index
    %2 = vector.load %arg2[%c0_1, %c0_2] : memref<32x64xbf16, #tpu.memory_space<vmem>>, vector<32x64xbf16>
    %cst = arith.constant dense<0.000000e+00> : vector<8x64xf32>
    %3 = tpu.matmul %1, %2, %cst {dimension_numbers = #tpu.dot_dimension_numbers<[1], [0], [0], [1], [0, 0, 1, 1], [], []>} : vector<8x32xbf16>, vector<32x64xbf16>, vector<8x64xf32> -> vector<8x64xf32>
    %c0_3 = arith.constant 0 : index
    %c0_4 = arith.constant 0 : index
    %4 = vector.load %arg3[%c0_3, %c0_4] : memref<1x64xf32, #tpu.memory_space<vmem>>, vector<1x64xf32>
    %5 = vector.broadcast %4 : vector<1x64xf32> to vector<8x64xf32>
    %6 = arith.addf %3, %5 : vector<8x64xf32>
    %cst_5 = arith.constant 0.000000e+00 : f32
    %7 = vector.broadcast %cst_5 : f32 to vector<8x64xf32>
    %8 = arith.cmpf ogt, %6, %7 : vector<8x64xf32>
    %cst_6 = arith.constant 0.00999999977 : f32
    %9 = vector.broadcast %cst_6 : f32 to vector<8x64xf32>
    %10 = arith.mulf %9, %6 : vector<8x64xf32>
    %11 = arith.select %8, %6, %10 : vector<8x64xi1>, vector<8x64xf32>
    %12 = arith.truncf %11 : vector<8x64xf32> to vector<8x64xbf16>
    %c0_7 = arith.constant 0 : index
    %c0_8 = arith.constant 0 : index
    %13 = vector.load %arg4[%c0_7, %c0_8] : memref<64x256xbf16, #tpu.memory_space<vmem>>, vector<64x256xbf16>
    %cst_9 = arith.constant dense<0.000000e+00> : vector<8x256xf32>
    %14 = tpu.matmul %12, %13, %cst_9 {dimension_numbers = #tpu.dot_dimension_numbers<[1], [0], [0], [1], [0, 0, 1, 1], [], []>} : vector<8x64xbf16>, vector<64x256xbf16>, vector<8x256xf32> -> vector<8x256xf32>
    %c0_10 = arith.constant 0 : index
    %c0_11 = arith.constant 0 : index
    %15 = vector.load %arg5[%c0_10, %c0_11] : memref<1x256xf32, #tpu.memory_space<vmem>>, vector<1x256xf32>
    %16 = vector.broadcast %15 : vector<1x256xf32> to vector<8x256xf32>
    %17 = arith.addf %14, %16 : vector<8x256xf32>
    %cst_12 = arith.constant 0.000000e+00 : f32
    %18 = vector.broadcast %cst_12 : f32 to vector<8x256xf32>
    %19 = arith.cmpf ogt, %17, %18 : vector<8x256xf32>
    %cst_13 = arith.constant 0.00999999977 : f32
    %20 = vector.broadcast %cst_13 : f32 to vector<8x256xf32>
    %21 = arith.mulf %20, %17 : vector<8x256xf32>
    %22 = arith.select %19, %17, %21 : vector<8x256xi1>, vector<8x256xf32>
    %23 = arith.truncf %22 : vector<8x256xf32> to vector<8x256xbf16>
    %c0_14 = arith.constant 0 : index
    %c0_15 = arith.constant 0 : index
    %24 = vector.load %arg6[%c0_14, %c0_15] : memref<256x256xbf16, #tpu.memory_space<vmem>>, vector<256x256xbf16>
    %cst_16 = arith.constant dense<0.000000e+00> : vector<8x256xf32>
    %25 = tpu.matmul %23, %24, %cst_16 {dimension_numbers = #tpu.dot_dimension_numbers<[1], [0], [0], [1], [0, 0, 1, 1], [], []>} : vector<8x256xbf16>, vector<256x256xbf16>, vector<8x256xf32> -> vector<8x256xf32>
    %c0_17 = arith.constant 0 : index
    %c0_18 = arith.constant 0 : index
    %26 = vector.load %arg7[%c0_17, %c0_18] : memref<1x256xf32, #tpu.memory_space<vmem>>, vector<1x256xf32>
    %27 = vector.broadcast %26 : vector<1x256xf32> to vector<8x256xf32>
    %28 = arith.addf %25, %27 : vector<8x256xf32>
    %cst_19 = arith.constant 0.000000e+00 : f32
    %29 = vector.broadcast %cst_19 : f32 to vector<8x256xf32>
    %30 = arith.cmpf ogt, %28, %29 : vector<8x256xf32>
    %cst_20 = arith.constant 0.00999999977 : f32
    %31 = vector.broadcast %cst_20 : f32 to vector<8x256xf32>
    %32 = arith.mulf %31, %28 : vector<8x256xf32>
    %33 = arith.select %30, %28, %32 : vector<8x256xi1>, vector<8x256xf32>
    %34 = arith.truncf %33 : vector<8x256xf32> to vector<8x256xbf16>
    %c0_21 = arith.constant 0 : index
    %c0_22 = arith.constant 0 : index
    %35 = vector.load %arg8[%c0_21, %c0_22] : memref<256x128xbf16, #tpu.memory_space<vmem>>, vector<256x128xbf16>
    %cst_23 = arith.constant dense<0.000000e+00> : vector<8x128xf32>
    %36 = tpu.matmul %34, %35, %cst_23 {dimension_numbers = #tpu.dot_dimension_numbers<[1], [0], [0], [1], [0, 0, 1, 1], [], []>} : vector<8x256xbf16>, vector<256x128xbf16>, vector<8x128xf32> -> vector<8x128xf32>
    %c0_24 = arith.constant 0 : index
    %c0_25 = arith.constant 0 : index
    %37 = vector.load %arg9[%c0_24, %c0_25] : memref<1x128xf32, #tpu.memory_space<vmem>>, vector<1x128xf32>
    %38 = vector.broadcast %37 : vector<1x128xf32> to vector<8x128xf32>
    %39 = arith.addf %36, %38 : vector<8x128xf32>
    %cst_26 = arith.constant 0.000000e+00 : f32
    %40 = vector.broadcast %cst_26 : f32 to vector<8x128xf32>
    %41 = arith.cmpf ogt, %39, %40 : vector<8x128xf32>
    %cst_27 = arith.constant 0.00999999977 : f32
    %42 = vector.broadcast %cst_27 : f32 to vector<8x128xf32>
    %43 = arith.mulf %42, %39 : vector<8x128xf32>
    %44 = arith.select %41, %39, %43 : vector<8x128xi1>, vector<8x128xf32>
    %45 = arith.truncf %44 : vector<8x128xf32> to vector<8x128xbf16>
    %c0_28 = arith.constant 0 : index
    %c0_29 = arith.constant 0 : index
    %46 = vector.load %arg10[%c0_28, %c0_29] : memref<128x128xbf16, #tpu.memory_space<vmem>>, vector<128x128xbf16>
    %cst_30 = arith.constant dense<0.000000e+00> : vector<8x128xf32>
    %47 = tpu.matmul %45, %46, %cst_30 {dimension_numbers = #tpu.dot_dimension_numbers<[1], [0], [0], [1], [0, 0, 1, 1], [], []>} : vector<8x128xbf16>, vector<128x128xbf16>, vector<8x128xf32> -> vector<8x128xf32>
    %c0_31 = arith.constant 0 : index
    %c0_32 = arith.constant 0 : index
    %48 = vector.load %arg11[%c0_31, %c0_32] : memref<1x128xf32, #tpu.memory_space<vmem>>, vector<1x128xf32>
    %49 = vector.broadcast %48 : vector<1x128xf32> to vector<8x128xf32>
    %50 = arith.addf %47, %49 : vector<8x128xf32>
    %c0_33 = arith.constant 0 : index
    %c0_34 = arith.constant 0 : index
    %51 = vector.load %arg12[%c0_33, %c0_34] : memref<8x128xf32, #tpu.memory_space<vmem>>, vector<8x128xf32>
    tpu.vector_store %arg12[%c0_33, %c0_34], %50 {strides = array<i32>} : memref<8x128xf32, #tpu.memory_space<vmem>>, vector<8x128xf32>,
    return
  }
  func.func @transform_0(%arg0: i32) -> (i32, i32) {
    %c0_i32 = arith.constant 0 : i32
    %c0_i32_0 = arith.constant 0 : i32
    return %arg0, %c0_i32 : i32, i32
  }
  func.func @transform_1(%arg0: i32) -> (i32, i32) {
    %c0_i32 = arith.constant 0 : i32
    %c0_i32_0 = arith.constant 0 : i32
    %c0_i32_1 = arith.constant 0 : i32
    return %c0_i32, %c0_i32_0 : i32, i32
  }
  func.func @transform_2(%arg0: i32) -> (i32, i32) {
    %c0_i32 = arith.constant 0 : i32
    %c0_i32_0 = arith.constant 0 : i32
    %c0_i32_1 = arith.constant 0 : i32
    return %c0_i32, %c0_i32_0 : i32, i32
  }
  func.func @transform_3(%arg0: i32) -> (i32, i32) {
    %c0_i32 = arith.constant 0 : i32
    %c0_i32_0 = arith.constant 0 : i32
    %c0_i32_1 = arith.constant 0 : i32
    return %c0_i32, %c0_i32_0 : i32, i32
  }
  func.func @transform_4(%arg0: i32) -> (i32, i32) {
    %c0_i32 = arith.constant 0 : i32
    %c0_i32_0 = arith.constant 0 : i32
    %c0_i32_1 = arith.constant 0 : i32
    return %c0_i32, %c0_i32_0 : i32, i32
  }
  func.func @transform_5(%arg0: i32) -> (i32, i32) {
    %c0_i32 = arith.constant 0 : i32
    %c0_i32_0 = arith.constant 0 : i32
    %c0_i32_1 = arith.constant 0 : i32
    return %c0_i32, %c0_i32_0 : i32, i32
  }
  func.func @transform_6(%arg0: i32) -> (i32, i32) {
    %c0_i32 = arith.constant 0 : i32
    %c0_i32_0 = arith.constant 0 : i32
    %c0_i32_1 = arith.constant 0 : i32
    return %c0_i32, %c0_i32_0 : i32, i32
  }
  func.func @transform_7(%arg0: i32) -> (i32, i32) {
    %c0_i32 = arith.constant 0 : i32
    %c0_i32_0 = arith.constant 0 : i32
    %c0_i32_1 = arith.constant 0 : i32
    return %c0_i32, %c0_i32_0 : i32, i32
  }
  func.func @transform_8(%arg0: i32) -> (i32, i32) {
    %c0_i32 = arith.constant 0 : i32
    %c0_i32_0 = arith.constant 0 : i32
    %c0_i32_1 = arith.constant 0 : i32
    return %c0_i32, %c0_i32_0 : i32, i32
  }
  func.func @transform_9(%arg0: i32) -> (i32, i32) {
    %c0_i32 = arith.constant 0 : i32
    %c0_i32_0 = arith.constant 0 : i32
    %c0_i32_1 = arith.constant 0 : i32
    return %c0_i32, %c0_i32_0 : i32, i32
  }
  func.func @transform_10(%arg0: i32) -> (i32, i32) {
    %c0_i32 = arith.constant 0 : i32
    %c0_i32_0 = arith.constant 0 : i32
    %c0_i32_1 = arith.constant 0 : i32
    return %c0_i32, %c0_i32_0 : i32, i32
  }
  func.func @transform_11(%arg0: i32) -> (i32, i32) {
    %c0_i32 = arith.constant 0 : i32
    %c0_i32_0 = arith.constant 0 : i32
    return %arg0, %c0_i32 : i32, i32
  }
}

</mosaic_0001>

<bundles_post_ra>
// kernel: tpu_custom_call.1
= control target key start
LH: loop header
LB: loop body
LE: loop exit
PB: predicated region body
PF: predicated region fallthrough
CT: control target
= control target key end

     0   :  { %16 = vsyncpa [#allocation3], 0  ;;  %s1384_s0 = inlined_call_operand.hbm [shape: f32[8,32], index: 0, kind: input, shape index: {}]   ;;  %s1385_s1 = inlined_call_operand.hbm [shape: bf16[32,64], index: 1, kind: input, shape index: {}]   ;;  %s1386_s2 = inlined_call_operand.vmem [shape: f32[1,64], index: 2, kind: input, shape index: {}]   ;;  %s1387_s3 = inlined_call_operand.hbm [shape: bf16[64,256], index: 3, kind: input, shape index: {}]   ;;  %s1388_s4 = inlined_call_operand.vmem [shape: f32[1,256], index: 4, kind: input, shape index: {}]   ;;  %s1389_s5 = inlined_call_operand.hbm [shape: bf16[256,256], index: 5, kind: input, shape index: {}]   ;;  %s1390_s6 = inlined_call_operand.vmem [shape: f32[1,256], index: 6, kind: input, shape index: {}]   ;;  %s1391_s7 = inlined_call_operand.hbm [shape: bf16[256,128], index: 7, kind: input, shape index: {}]   ;;  %s1392_s8 = inlined_call_operand.vmem [shape: f32[1,128], index: 8, kind: input, shape index: {}]   ;;  %s1393_s9 = inlined_call_operand.hbm [shape: bf16[128,128], index: 9, kind: input, shape index: {}]   ;;  %s1394_s10 = inlined_call_operand.vmem [shape: f32[1,128], index: 10, kind: input, shape index: {}]   ;;  %s1395_s11 = inlined_call_operand.hbm [shape: f32[8,128], index: 11, kind: output, shape index: {}]  }
   0x1   :  { %17 = vsyncpa [#allocation6], 0 }
   0x2   :  { %18 = vsyncpa [#allocation9], 0 }
   0x3   :  { %19 = vsyncpa [#allocation12], 0 }
   0x4   :  { %20 = vsyncpa [#allocation4], 0  ;;  %s1251_s17 = smov [#allocation5]  }
   0x5   :  { %s36_s18 = sshll.u32 %s1251_s17, 4  ;;  %s37_s18 = int_to_ptr.vmem [resolvable:$true] %s36_s18 }
   0x6   :  { %s1109_s19 = scalar_lea.vmem %s37_s18, 256  ;;  %p1114_p1 = scmp.lt.s32.totalorder %s37_s18, %s37_s18 }
   0x7   :  { %p1110_p0 = scmp.ne.s32.totalorder %s37_s18, %s1109_s19  ;;  %p1115_p2 = scmp.lt.s32.totalorder %s1109_s19, %s1109_s19 }
   0x9   :  { %p1116_p3 = por %p1115_p2, %p1114_p1 }
   0xb   :  { %p1117_p4 = pnand %p1116_p3, %p1110_p0 }
   0xd   :  { %1120 = shalt.err (!%p1117_p4)
}
   0xe   :  { %s1252_s20 = smov 64   ;;  %s1253_s21 = smov 4  }
   0xf   :  { %42 = dma.hbm_to_vmem [thread:$0]  %s1385_s1, 256, %s37_s18, [#allocation6], %s1252_s20, %s1252_s20, %s1253_s21  }
  0x10   :  { %s1254_s24 = smov [#allocation8]   ;;  %s1255_s26 = smov [#allocation2]  }
  0x11   :  { %s64_s25 = sshll.u32 %s1254_s24, 4  ;;  %s27_s27 = sshll.u32 %s1255_s26, 4  ;;  %s65_s25 = int_to_ptr.vmem [resolvable:$true] %s64_s25  ;;  %s28_s27 = int_to_ptr.vmem [resolvable:$true] %s27_s27 }
  0x12   :  { %s1129_s28 = scalar_lea.vmem %s65_s25, 4096  ;;  %p1134_p6 = scmp.lt.s32.totalorder %s65_s25, %s65_s25 }
  0x13   :  { %p1130_p5 = scmp.ne.s32.totalorder %s65_s25, %s1129_s28  ;;  %p1135_p7 = scmp.lt.s32.totalorder %s1129_s28, %s1129_s28 }
  0x15   :  { %p1136_p8 = por %p1135_p7, %p1134_p6 }
  0x17   :  { %p1137_p9 = pnand %p1136_p8, %p1130_p5 }
  0x19   :  { %1140 = shalt.err (!%p1137_p9)
}
  0x1a   :  { %s1256_s29 = smov 128   ;;  %s1257_s30 = smov 8  }
  0x1b   :  { %70 = dma.hbm_to_vmem [thread:$0]  %s1389_s5, 4096, %s65_s25, [#allocation9], %s1256_s29, %s1256_s29, %s1257_s30  }
  0x1c   :  { %s1149_s1 = scalar_lea.vmem %s28_s27, 128  ;;  %p1154_p11 = scmp.lt.s32.totalorder %s28_s27, %s28_s27 }
  0x1d   :  { %p1150_p10 = scmp.ne.s32.totalorder %s28_s27, %s1149_s1  ;;  %p1155_p12 = scmp.lt.s32.totalorder %s1149_s1, %s1149_s1 }
  0x1f   :  { %p1156_p13 = por %p1155_p12, %p1154_p11 }
  0x21   :  { %p1157_p0 = pnand %p1156_p13, %p1150_p10 }
  0x23   :  { %1160 = shalt.err (!%p1157_p0)
}
  0x24   :  { %30 = dma.hbm_to_vmem [thread:$0]  %s1384_s0, 128, %s28_s27, [#allocation3]  }
  0x25   :  { %s1258_s16 = smov [#allocation7]   ;;  %s1259_s18 = smov [#allocation10]  }
  0x26   :  { %s50_s17 = sshll.u32 %s1258_s16, 4  ;;  %s78_s19 = sshll.u32 %s1259_s18, 4  ;;  %s51_s17 = int_to_ptr.vmem [resolvable:$true] %s50_s17  ;;  %s79_s19 = int_to_ptr.vmem [resolvable:$true] %s78_s19 }
  0x27   :  { %s1169_s22 = scalar_lea.vmem %s51_s17, 1024  ;;  %p1174_p2 = scmp.lt.s32.totalorder %s51_s17, %s51_s17 }
  0x28   :  { %p1170_p1 = scmp.ne.s32.totalorder %s51_s17, %s1169_s22  ;;  %p1175_p3 = scmp.lt.s32.totalorder %s1169_s22, %s1169_s22 }
  0x2a   :  { %p1176_p4 = por %p1175_p3, %p1174_p2 }
  0x2c   :  { %p1177_p5 = pnand %p1176_p4, %p1170_p1 }
  0x2e   :  { %1180 = shalt.err (!%p1177_p5)
}
  0x2f   :  { %56 = dma.hbm_to_vmem [thread:$0]  %s1387_s3, 1024, %s51_s17, [#allocation6], %s1256_s29, %s1256_s29, %s1257_s30  }
  0x30   :  { %s1189_s24 = scalar_lea.vmem %s79_s19, 2048  ;;  %p1194_p7 = scmp.lt.s32.totalorder %s79_s19, %s79_s19 }
  0x31   :  { %p1190_p6 = scmp.ne.s32.totalorder %s79_s19, %s1189_s24  ;;  %p1195_p8 = scmp.lt.s32.totalorder %s1189_s24, %s1189_s24 }
  0x33   :  { %p1196_p9 = por %p1195_p8, %p1194_p7 }
  0x35   :  { %p1197_p10 = pnand %p1196_p9, %p1190_p6 }
  0x37   :  { %1200 = shalt.err (!%p1197_p10)
}
  0x38   :  { %84 = dma.hbm_to_vmem [thread:$0]  %s1391_s7, 2048, %s79_s19, [#allocation9], %s1252_s20, %s1252_s20, %s1253_s21  }
  0x39   :  { %s1260_s26 = smov [#allocation11]  }
  0x3a   :  { %s92_s27 = sshll.u32 %s1260_s26, 4  ;;  %s93_s27 = int_to_ptr.vmem [resolvable:$true] %s92_s27 }
  0x3b   :  { %s1209_s28 = scalar_lea.vmem %s93_s27, 1024  ;;  %p1214_p12 = scmp.lt.s32.totalorder %s93_s27, %s93_s27 }
  0x3c   :  { %p1210_p11 = scmp.ne.s32.totalorder %s93_s27, %s1209_s28  ;;  %p1215_p13 = scmp.lt.s32.totalorder %s1209_s28, %s1209_s28 }
  0x3e   :  { %p1216_p0 = por %p1215_p13, %p1214_p12 }
  0x40   :  { %p1217_p1 = pnand %p1216_p0, %p1210_p11 }
  0x42   :  { %1220 = shalt.err (!%p1217_p1)
}
  0x43   :  { %98 = dma.hbm_to_vmem [thread:$0]  %s1393_s9, 1024, %s93_s27, [#allocation12], %s1252_s20, %s1252_s20, %s1253_s21  }
  0x44   :  { %1241 = dma.done.wait [#allocation3], 128  }
  0x45   :  { %1242 = vsyncadd [#allocation3], 4294967168 }
  0x46   :  { %1243 = dma.done.wait [#allocation6], 1280  }
  0x47   :  { %1244 = vsyncadd [#allocation6], 4294966016 }
  0x48   :  { %1245 = dma.done.wait [#allocation9], 6144  }
  0x49   :  { %1246 = vsyncadd [#allocation9], 4294961152 }
  0x4a   :  { %1247 = dma.done.wait [#allocation12], 1024  }
  0x4b   :  { %1248 = vsyncadd [#allocation12], 4294966272  ;;  %v1261_v0 = vmov 0.0   ;;  %vm1262_vm0 = vmmov 0   ;;  %v1015_v1 = vld [vmem:[#allocation5 + $0x8] sm:$0xff]   ;;  %v1016_v2 = vld [vmem:[#allocation5] sm:$0xff]  }
  0x4c   :  { %973 = vmatprep.subr.bf16.mxu0 %v1261_v0  ;;  %977 = vmatprep.mubr.msk.bf16.mxu0 %vm1262_vm0, %v1261_v0  ;;  %v120_v3 = vld [vmem:[#allocation2] sm:$0xff]  ;;  %v1017_v4 = vld [vmem:[#allocation7 + $0x34] ss:$8 sps:$4 sm:$0xff]   ;;  %v1019_v5 = vld [vmem:[#allocation7 + $0x30] ss:$8 sps:$4 sm:$0xff]   ;;  %vm145_vm1 = vcmask 261120  }
  0x4d   :  { %974 = vmatpush3.bf16.msra.mxu0 %v1015_v1  ;;  %v1020_v6 = vld [vmem:[#allocation7 + $0x24] ss:$8 sps:$4 sm:$0xff]   ;;  %v121_v7 = vpack.c.bf16 %v120_v3, %v120_v3  ;;  %265 = vmatprep.subr.bf16.mxu1 %v1017_v4  ;;  %v1022_v8 = vld [vmem:[#allocation7 + $0x20] ss:$8 sps:$4 sm:$0xff]   ;;  %v1023_v9 = vld [vmem:[#allocation7 + $0x14] ss:$8 sps:$4 sm:$0xff]   ;;  %v203_v3 = vlaneseq }
  0x4e   :  { %975 = vmatprep.subr.bf16.mxu0 %v1261_v0  ;;  %266 = vmatpush1.bf16.msra.mxu1 %v1019_v5  ;;  %v1025_v10 = vld [vmem:[#allocation7 + $0x10] ss:$8 sps:$4 sm:$0xff]   ;;  %v1026_v11 = vld [vmem:[#allocation7 + $0x4] ss:$8 sps:$4 sm:$0xff]   ;;  %v1028_v12 = vld [vmem:[#allocation7] ss:$8 sps:$4 sm:$0xff]  }
  0x4f   :  { %267 = vmatprep.subr.bf16.mxu1 %v1020_v6  ;;  %v1263_v13 = vmov 0   ;;  %v1029_v14 = vld [vmem:[#allocation8 + $0x70] ss:$8 sps:$4 sm:$0xff]   ;;  %v1031_v15 = vld [vmem:[#allocation8 + $0x74] ss:$8 sps:$4 sm:$0xff]   ;;  %vm253_vm3 = vcmask 523264  }
  0x50   :  { %289 = vmatprep.mubr.bf16.mxu1 %v1263_v13  ;;  %v1034_v16 = vld [vmem:[#allocation8 + $0x64] ss:$8 sps:$4 sm:$0xff]   ;;  %v1032_v17 = vld [vmem:[#allocation8 + $0x60] ss:$8 sps:$4 sm:$0xff]   ;;  %v1037_v18 = vld [vmem:[#allocation8 + $0x54] ss:$8 sps:$4 sm:$0xff]  }
  0x51   :  { %976 = vmatpush3.bf16.msra.mxu0 %v1016_v2  ;;  %v1035_v19 = vld [vmem:[#allocation8 + $0x50] ss:$8 sps:$4 sm:$0xff]   ;;  %v1040_v20 = vld [vmem:[#allocation8 + $0x44] ss:$8 sps:$4 sm:$0xff]   ;;  %v1038_v21 = vld [vmem:[#allocation8 + $0x40] ss:$8 sps:$4 sm:$0xff]  }
  0x52   :  { %268 = vmatpush1.bf16.msra.mxu1 %v1022_v8  ;;  %510 = vmatprep.subr.bf16.mxu0 %v1031_v15  ;;  %v1043_v22 = vld [vmem:[#allocation8 + $0x34] ss:$8 sps:$4 sm:$0xff]   ;;  %v1041_v23 = vld [vmem:[#allocation8 + $0x30] ss:$8 sps:$4 sm:$0xff]   ;;  %v1046_v24 = vld [vmem:[#allocation8 + $0x24] ss:$8 sps:$4 sm:$0xff]  }
  0x53   :  { %269 = vmatprep.subr.bf16.mxu1 %v1023_v9  ;;  %v1044_v25 = vld [vmem:[#allocation8 + $0x20] ss:$8 sps:$4 sm:$0xff]   ;;  %v1049_v26 = vld [vmem:[#allocation8 + $0x14] ss:$8 sps:$4 sm:$0xff]   ;;  %v1047_v27 = vld [vmem:[#allocation8 + $0x10] ss:$8 sps:$4 sm:$0xff]  }
  0x54   :  { %978 = vmatmul.mubr.msk.bf16.vlgmr.msra.gmra.mxu0 %vm145_vm1, %v121_v7  ;;  %v1052_v28 = vld [vmem:[#allocation8 + $0x4] ss:$8 sps:$4 sm:$0xff]   ;;  %v1050_v29 = vld [vmem:[#allocation8] ss:$8 sps:$4 sm:$0xff]   ;;  %v1055_v30 = vld [vmem:[#allocation8 + $0xf4] ss:$8 sps:$4 sm:$0xff]  }
  0x55   :  { %511 = vmatpush1.bf16.msra.mxu0 %v1029_v14  ;;  %v1053_v31 = vld [vmem:[#allocation8 + $0xf0] ss:$8 sps:$4 sm:$0xff]   ;;  %v1058_v32 = vld [vmem:[#allocation8 + $0xe4] ss:$8 sps:$4 sm:$0xff]   ;;  %v1056_v33 = vld [vmem:[#allocation8 + $0xe0] ss:$8 sps:$4 sm:$0xff]  }
  0x56   :  { %270 = vmatpush1.bf16.msra.mxu1 %v1025_v10  ;;  %512 = vmatprep.subr.bf16.mxu0 %v1034_v16  ;;  %v1061_v34 = vld [vmem:[#allocation8 + $0xd4] ss:$8 sps:$4 sm:$0xff]   ;;  %v1059_v35 = vld [vmem:[#allocation8 + $0xd0] ss:$8 sps:$4 sm:$0xff]   ;;  %v1064_v36 = vld [vmem:[#allocation8 + $0xc4] ss:$8 sps:$4 sm:$0xff]  }
  0x57   :  { %271 = vmatprep.subr.bf16.mxu1 %v1026_v11  ;;  %v1062_v37 = vld [vmem:[#allocation8 + $0xc0] ss:$8 sps:$4 sm:$0xff]   ;;  %v1067_v38 = vld [vmem:[#allocation8 + $0xb4] ss:$8 sps:$4 sm:$0xff]   ;;  %v1065_v39 = vld [vmem:[#allocation8 + $0xb0] ss:$8 sps:$4 sm:$0xff]  }
  0x58   :  { %v1070_v40 = vld [vmem:[#allocation8 + $0xa4] ss:$8 sps:$4 sm:$0xff]   ;;  %v1068_v41 = vld [vmem:[#allocation8 + $0xa0] ss:$8 sps:$4 sm:$0xff]   ;;  %v1073_v51 = vld [vmem:[#allocation8 + $0x94] ss:$8 sps:$4 sm:$0xff]  }
  0x59   :  { %513 = vmatpush1.bf16.msra.mxu0 %v1032_v17  ;;  %v868_v42 = vld [vmem:[%s1386_s2] ss:$0 sm:$0xff]  ;;  %v1071_v52 = vld [vmem:[#allocation8 + $0x90] ss:$8 sps:$4 sm:$0xff]   ;;  %v1076_v53 = vld [vmem:[#allocation8 + $0x84] ss:$8 sps:$4 sm:$0xff]  }
  0x5a   :  { %272 = vmatpush1.bf16.msra.mxu1 %v1028_v12  ;;  %514 = vmatprep.subr.bf16.mxu0 %v1037_v18  ;;  %v1074_v54 = vld [vmem:[#allocation8 + $0x80] ss:$8 sps:$4 sm:$0xff]   ;;  %v1077_v55 = vld [vmem:[#allocation10 + $0x78] sm:$0xff]   ;;  %v1079_v57 = vld [vmem:[#allocation10 + $0x70] sm:$0xff]   ;;  %v204_v4 = vshrl.u32 %v203_v3, 7  ;;  %s1264_s1 = smov [#allocation13]  }
  0x5b   :  { %v1078_v56 = vld [vmem:[#allocation10 + $0x38] sm:$0xff]   ;;  %942 = vmatprep.subr.bf16.mxu1 %v1077_v55  ;;  %v1080_v58 = vld [vmem:[#allocation10 + $0x30] sm:$0xff]   ;;  %v1081_v59 = vld [vmem:[#allocation10 + $0x68] sm:$0xff]   ;;  %s856_s14 = sshll.u32 %s1264_s1, 4  ;;  %s857_s14 = int_to_ptr.vmem [resolvable:$true] %s856_s14 }
  0x5c   :  { %v1082_v60 = vld [vmem:[#allocation10 + $0x28] sm:$0xff]   ;;  %v1083_v61 = vld [vmem:[#allocation10 + $0x60] sm:$0xff]   ;;  %v1085_v63 = vld [vmem:[#allocation10 + $0x58] sm:$0xff]   ;;  %v205_v5 = vsub.s32 0, %v204_v4  ;;  %v209_v7 = vsub.s32 1, %v204_v4  ;;  %p1226_p3 = scmp.lt.s32.totalorder %s857_s14, %s857_s14 }
  0x5d   :  { %515 = vmatpush1.bf16.msra.mxu0 %v1035_v19  ;;  %v1084_v62 = vld [vmem:[#allocation10 + $0x20] sm:$0xff]   ;;  %v1086_v1 = vld [vmem:[#allocation10 + $0x18] sm:$0xff]   ;;  %v1087_v2 = vld [vmem:[#allocation10 + $0x50] sm:$0xff]  }
  0x5e   :  { %516 = vmatprep.subr.bf16.mxu0 %v1040_v20  ;;  %v201_v6 = vld [vmem:[%s1388_s4] sm:$0x3] }
  0x5f   :  { %v206_v8 = vrot.slane %v201_v6, %v205_v5  ;;  %v210_v9 = vrot.slane %v201_v6, %v209_v7 }
  0x61   :  { %517 = vmatpush1.bf16.msra.mxu0 %v1038_v21 }
  0x62   :  { %518 = vmatprep.subr.bf16.mxu0 %v1043_v22  ;;  %v1088_v22 = vld [vmem:[#allocation10 + $0x10] sm:$0xff]  }
  0x65   :  { %519 = vmatpush1.bf16.msra.mxu0 %v1041_v23  ;;  %v1089_v23 = vld [vmem:[#allocation10 + $0x48] sm:$0xff]  }
  0x66   :  { %520 = vmatprep.subr.bf16.mxu0 %v1046_v24  ;;  %v1090_v24 = vld [vmem:[#allocation10 + $0x8] sm:$0xff]  }
  0x69   :  { %521 = vmatpush1.bf16.msra.mxu0 %v1044_v25  ;;  %v1091_v25 = vld [vmem:[#allocation10 + $0x40] sm:$0xff]  }
  0x6a   :  { %522 = vmatprep.subr.bf16.mxu0 %v1049_v26  ;;  %v1092_v26 = vld [vmem:[#allocation10] sm:$0xff]  }
  0x6d   :  { %523 = vmatpush1.bf16.msra.mxu0 %v1047_v27  ;;  %v338_v27 = vld [vmem:[%s1390_s6] sm:$0x3] }
  0x6e   :  { %524 = vmatprep.subr.bf16.mxu0 %v1052_v28  ;;  %v343_v28 = vrot.slane %v338_v27, %v205_v5 }
  0x71   :  { %525 = vmatpush1.bf16.msra.mxu0 %v1050_v29  ;;  %v347_v29 = vrot.slane %v338_v27, %v209_v7 }
  0x72   :  { %526 = vmatprep.subr.bf16.mxu0 %v1055_v30 }
  0x75   :  { %527 = vmatpush2.bf16.msra.mxu0 %v1053_v31 }
  0x76   :  { %528 = vmatprep.subr.bf16.mxu0 %v1058_v32 }
  0x79   :  { %529 = vmatpush2.bf16.msra.mxu0 %v1056_v33 }
  0x7a   :  { %530 = vmatprep.subr.bf16.mxu0 %v1061_v34 }
  0x7d   :  { %531 = vmatpush2.bf16.msra.mxu0 %v1059_v35 }
  0x7e   :  { %532 = vmatprep.subr.bf16.mxu0 %v1064_v36 }
  0x81   :  { %533 = vmatpush2.bf16.msra.mxu0 %v1062_v37 }
  0x82   :  { %534 = vmatprep.subr.bf16.mxu0 %v1067_v38 }
  0x85   :  { %535 = vmatpush2.bf16.msra.mxu0 %v1065_v39 }
  0x86   :  { %536 = vmatprep.subr.bf16.mxu0 %v1070_v40 }
  0x89   :  { %537 = vmatpush2.bf16.msra.mxu0 %v1068_v41  ;;  %v1093_v41 = vld [vmem:[#allocation11 + $0x38] sm:$0xff]  }
  0x8a   :  { %538 = vmatprep.subr.bf16.mxu0 %v1073_v51  ;;  %v913_v51 = vld [vmem:[%s1392_s8] ss:$0 sm:$0xff]  ;;  %s1221_s8 = scalar_lea.vmem %s857_s14, 128 }
  0x8b   :  { %p1222_p2 = scmp.ne.s32.totalorder %s857_s14, %s1221_s8  ;;  %p1227_p4 = scmp.lt.s32.totalorder %s1221_s8, %s1221_s8 }
  0x8d   :  { %539 = vmatpush2.bf16.msra.mxu0 %v1071_v52  ;;  %p1228_p5 = por %p1227_p4, %p1226_p3 }
  0x8e   :  { %540 = vmatprep.subr.bf16.mxu0 %v1076_v53 }
  0x8f   :  { %p1229_p6 = pnand %p1228_p5, %p1222_p2 }
  0x91   :  { %541 = vmatpush2.bf16.msra.mxu0 %v1074_v54 }
 0x114   :  { %v183_v43 = vpop.f32.mrf.mxu0 }
 0x115   :  { %v184_v44 = vadd.f32 %v868_v42, %v183_v43  ;;  %v1094_v43 = vld [vmem:[#allocation11 + $0x30] sm:$0xff]  }
 0x116   :  { %v979_v45 = vpop.f32.mrf.mxu0 }
 0x117   :  { %vm189_vm2 = vcmp.gt.f32.partialorder %v184_v44, 0.0  ;;  %v190_v46 = vmul.f32 0.01, %v184_v44  ;;  %v1096_v45 = vld [vmem:[#allocation11 + $0x20] sm:$0xff]  }
 0x118   :  { %v186_v47 = vpop.f32.mrf.mxu0 }
 0x119   :  { %v191_v48 = vsel %vm189_vm2, %v184_v44, %v190_v46  ;;  %v1095_v44 = vld [vmem:[#allocation11 + $0x28] sm:$0xff]   ;;  %v1097_v46 = vld [vmem:[#allocation11 + $0x18] sm:$0xff]   ;;  %v1098_v47 = vld [vmem:[#allocation11 + $0x10] sm:$0xff]  }
 0x11a   :  { %v192_v49 = vpack.c.bf16 %v191_v48, %v191_v48  ;;  %v980_v50 = vpop.f32.mrf.mxu0  ;;  %v1099_v48 = vld [vmem:[#allocation11 + $0x8] sm:$0xff]  }
 0x11c   :  { %880 = vmatmul.mubr.msk.bf16.vlgmr.msra.gmra.mxu1 %vm253_vm3, %v192_v49  ;;  %v1100_v49 = vld [vmem:[#allocation11] sm:$0xff]  }
 0x11d   :  { %943 = vmatpush3.bf16.msra.mxu1 %v1078_v56 }
 0x11e   :  { %944 = vmatprep.subr.bf16.mxu1 %v1079_v57 }
 0x121   :  { %945 = vmatpush3.bf16.msra.mxu1 %v1080_v58 }
 0x122   :  { %946 = vmatprep.subr.bf16.mxu1 %v1081_v59 }
 0x125   :  { %947 = vmatpush3.bf16.msra.mxu1 %v1082_v60 }
 0x126   :  { %948 = vmatprep.subr.bf16.mxu1 %v1083_v61 }
 0x129   :  { %949 = vmatpush3.bf16.msra.mxu1 %v1084_v62 }
 0x12a   :  { %950 = vmatprep.subr.bf16.mxu1 %v1085_v63 }
 0x12d   :  { %951 = vmatpush3.bf16.msra.mxu1 %v1086_v1 }
 0x12e   :  { %952 = vmatprep.subr.bf16.mxu1 %v1087_v2 }
 0x131   :  { %953 = vmatpush3.bf16.msra.mxu1 %v1088_v22 }
 0x132   :  { %954 = vmatprep.subr.bf16.mxu1 %v1089_v23 }
 0x135   :  { %955 = vmatpush3.bf16.msra.mxu1 %v1090_v24 }
 0x136   :  { %956 = vmatprep.subr.bf16.mxu1 %v1091_v25 }
 0x139   :  { %957 = vmatpush3.bf16.msra.mxu1 %v1092_v26 }
 0x13a   :  { %981 = vmatprep.subr.bf16.mxu1 %v1261_v0 }
 0x1dc   :  { %v291_v10 = vpop.f32.mrf.mxu1 }
 0x1dd   :  { %v292_v11 = vadd.f32 %v291_v10, %v206_v8 }
 0x1de   :  { %v293_v12 = vpop.f32.mrf.mxu1 }
 0x1df   :  { %vm298_vm4 = vcmp.gt.f32.partialorder %v292_v11, 0.0  ;;  %v300_v13 = vmul.f32 0.01, %v292_v11  ;;  %v294_v14 = vadd.f32 %v293_v12, %v210_v9 }
 0x1e0   :  { %v295_v15 = vpop.f32.mrf.mxu1 }
 0x1e1   :  { %vm299_vm5 = vcmp.gt.f32.partialorder %v294_v14, 0.0  ;;  %v301_v16 = vmul.f32 0.01, %v294_v14  ;;  %v302_v17 = vsel %vm298_vm4, %v292_v11, %v300_v13 }
 0x1e2   :  { %v296_v18 = vpop.f32.mrf.mxu1  ;;  %v304_v21 = vpack.c.bf16 %v302_v17, %v302_v17 }
 0x1e3   :  { %v303_v19 = vsel %vm299_vm5, %v294_v14, %v301_v16 }
 0x1e4   :  { %v305_v20 = vpack.c.bf16 %v303_v19, %v303_v19 }
 0x1e6   :  { %542 = vmatprep.mubr.bf16.mxu0 %v305_v20 }
 0x1e7   :  { %543 = vmatmul.mubr.bf16.vlgmr.msra.gmra.mxu0 %v304_v21 }
 0x2a7   :  { %v544_v30 = vpop.f32.mrf.mxu0 }
 0x2a8   :  { %v545_v31 = vadd.f32 %v544_v30, %v343_v28 }
 0x2a9   :  { %v546_v32 = vpop.f32.mrf.mxu0 }
 0x2aa   :  { %vm551_vm6 = vcmp.gt.f32.partialorder %v545_v31, 0.0  ;;  %v553_v33 = vmul.f32 0.01, %v545_v31  ;;  %v547_v34 = vadd.f32 %v546_v32, %v347_v29 }
 0x2ab   :  { %v548_v35 = vpop.f32.mrf.mxu0 }
 0x2ac   :  { %vm552_vm7 = vcmp.gt.f32.partialorder %v547_v34, 0.0  ;;  %v554_v36 = vmul.f32 0.01, %v547_v34  ;;  %v555_v37 = vsel %vm551_vm6, %v545_v31, %v553_v33 }
 0x2ad   :  { %v549_v38 = vpop.f32.mrf.mxu0  ;;  %v557_v42 = vpack.c.bf16 %v555_v37, %v555_v37 }
 0x2ae   :  { %v556_v39 = vsel %vm552_vm7, %v547_v34, %v554_v36 }
 0x2af   :  { %v558_v40 = vpack.c.bf16 %v556_v39, %v556_v39 }
 0x2b1   :  { %726 = vmatprep.mubr.bf16.mxu1 %v558_v40 }
 0x2b2   :  { %727 = vmatmul.mubr.bf16.vlgmr.msra.gmra.mxu1 %v557_v42 }
 0x2b3   :  { %982 = vmatpush3.bf16.msra.mxu1 %v1093_v41  ;;  %997 = vmatprep.mubr.msk.bf16.mxu1 %vm1262_vm0, %v1261_v0 }
 0x2b4   :  { %983 = vmatprep.subr.bf16.mxu1 %v1261_v0 }
 0x2b7   :  { %984 = vmatpush3.bf16.msra.mxu1 %v1094_v43 }
 0x2b8   :  { %985 = vmatprep.subr.bf16.mxu1 %v1261_v0 }
 0x2bb   :  { %986 = vmatpush3.bf16.msra.mxu1 %v1095_v44 }
 0x2bc   :  { %987 = vmatprep.subr.bf16.mxu1 %v1261_v0 }
 0x2bf   :  { %988 = vmatpush3.bf16.msra.mxu1 %v1096_v45 }
 0x2c0   :  { %989 = vmatprep.subr.bf16.mxu1 %v1261_v0 }
 0x2c3   :  { %990 = vmatpush3.bf16.msra.mxu1 %v1097_v46 }
 0x2c4   :  { %991 = vmatprep.subr.bf16.mxu1 %v1261_v0 }
 0x2c7   :  { %992 = vmatpush3.bf16.msra.mxu1 %v1098_v47 }
 0x2c8   :  { %993 = vmatprep.subr.bf16.mxu1 %v1261_v0 }
 0x2cb   :  { %994 = vmatpush3.bf16.msra.mxu1 %v1099_v48 }
 0x2cc   :  { %995 = vmatprep.subr.bf16.mxu1 %v1261_v0  ;;  %v930_v0 = vld [vmem:[%s1394_s10] ss:$0 sm:$0xff] }
 0x2cf   :  { %996 = vmatpush3.bf16.msra.mxu1 %v1100_v49 }
 0x372   :  { %v958_v50 = vpop.f32.mrf.mxu1 }
 0x374   :  { %v959_v52 = vpop.f32.mrf.mxu1 }
 0x375   :  { %v960_v53 = vadd.f32 %v959_v52, %v958_v50 }
 0x376   :  { %v961_v54 = vpop.f32.mrf.mxu1 }
 0x377   :  { %v729_v55 = vadd.f32 %v960_v53, %v913_v51 }
 0x378   :  { %v962_v56 = vpop.f32.mrf.mxu1 }
 0x379   :  { %vm734_vm8 = vcmp.gt.f32.partialorder %v729_v55, 0.0  ;;  %v735_v57 = vmul.f32 0.01, %v729_v55 }
 0x37b   :  { %v736_v58 = vsel %vm734_vm8, %v729_v55, %v735_v57 }
 0x37c   :  { %v737_v59 = vpack.c.bf16 %v736_v58, %v736_v58 }
 0x37e   :  { %998 = vmatmul.mubr.bf16.vlgmr.msra.gmra.mxu1 %v737_v59 }
 0x43e   :  { %v843_v60 = vpop.f32.mrf.mxu1 }
 0x43f   :  { %v844_v61 = vadd.f32 %v930_v0, %v843_v60 }
 0x440   :  { %v999_v62 = vpop.f32.mrf.mxu1 }
 0x441   :  { %849 = vst [vmem:[#allocation13] sm:$0xff] %v844_v61 }
 0x442   :  { %v846_v63 = vpop.f32.mrf.mxu1 }
 0x443   :  { %1232 = shalt.err (!%p1229_p6)
}
 0x444   :  { %859 = dma.vmem_to_hbm [thread:$0]  %s857_s14, 128, %s1395_s11, [#allocation4]   ;;  %v1000_v1 = vpop.f32.mrf.mxu1 }
 0x445   :  { %1249 = dma.done.wait [#allocation4], 128  }
 0x446   :  { %1250 = vsyncadd [#allocation4], 4294967168 }
 0x447   :  { %863 = vsyncpa [#allocation3], 1 }
 0x448   :  { %864 = vsyncpa [#allocation6], 1 }
 0x449   :  { %865 = vsyncpa [#allocation9], 1 }
 0x44a   :  { %866 = vsyncpa [#allocation12], 1 }
 0x44b   :  { %867 = vsyncpa [#allocation4], 1 }

</bundles_post_ra>
